<compile_context>
chip_gen: v6e
topology: v6e:2x2x1
jax: 0.10.0
libtpu: 0.0.40
codegen_flags: <defaults>
</compile_context>

<pallas_src>
import functools

import numpy as np
import jax
import jax.numpy as jnp
from jax.experimental import pallas as pl
from jax.experimental.pallas import tpu as pltpu


def _dice_kernel(pred_ref, targ_ref, out_ref, num_ref, den_ref, *,
                 smooth, p_pow, ts, s_valid, apply_mask):
    """Grid = (batch, spatial tiles). Each step: softmax over C on one (C, TS)
    tile, accumulate per-class num/den partials in VMEM scratch; finalize the
    per-batch loss (sum over classes of 1 - num/den) at the last spatial tile."""
    s = pl.program_id(1)

    @pl.when(s == 0)
    def _():
        num_ref[...] = jnp.zeros_like(num_ref)
        den_ref[...] = jnp.zeros_like(den_ref)

    p = pred_ref[0].astype(jnp.float32)   # (C, TS)
    t = targ_ref[0].astype(jnp.float32)   # (C, TS)

    # softmax over the channel (sublane) axis; one reciprocal per lane (EUP)
    # instead of C per-element divides (VALU). approx=False keeps 1e-5 rtol.
    m = jnp.max(p, axis=0, keepdims=True)           # (1, TS)
    e = jnp.exp(p - m)                               # (C, TS)
    z = jnp.sum(e, axis=0, keepdims=True)            # (1, TS)
    sm = e * pl.reciprocal(z, approx=False)          # (C, TS)

    if apply_mask:
        # Padded spatial positions: target was zero-padded (contributes 0), but
        # softmax of zero-padded logits is 1/C per class, so mask sm to 0.
        lane = jax.lax.broadcasted_iota(jnp.int32, p.shape, 1)
        valid = (s * ts + lane) < s_valid
        sm = jnp.where(valid, sm, 0.0)

    if p_pow == 2:                  # explicit squares: avoid generic pow -> exp/log on EUP
        sm_p = sm * sm
        t_p = t * t
    else:
        sm_p = sm ** p_pow
        t_p = t ** p_pow

    # Two separate lane reductions (XLU) summed afterwards instead of a full
    # (C, TS) elementwise add feeding one reduction.
    num_ref[...] += jnp.sum(sm * t, axis=1, keepdims=True)           # (C, 1)
    den_ref[...] += (jnp.sum(sm_p, axis=1, keepdims=True)
                     + jnp.sum(t_p, axis=1, keepdims=True))           # (C, 1)

    @pl.when(s == pl.num_programs(1) - 1)
    def _():
        num = num_ref[...] + smooth
        den = den_ref[...] + smooth
        loss_n = jnp.sum(1.0 - num / den)            # sum over classes (scalar)
        # lane-dense per-batch partial (128-wide splat); wrapper reads lane 0
        out_ref[...] = jnp.zeros(out_ref.shape, jnp.float32) + loss_n


def dice_loss(predict, target, *, smooth=1.0, p_pow=2):
    """DiceLoss forward (weight=None, ignore_index=None, reduction='mean').
    Inputs may be f32 or bf16; compute is always f32 inside the kernel."""
    assert predict.shape == target.shape, "predict & target shape do not match"
    N, C = predict.shape[0], predict.shape[1]
    S = int(np.prod(predict.shape[2:]))
    pred = predict.reshape(N, C, S)
    targ = target.reshape(N, C, S)

    # Spatial tile: multiple of 128 lanes, sized so 2 inputs x 2 pipeline
    # buffers stay within ~8 MiB of scoped VMEM on v5e/v6e/v7x; capped at
    # 2048 lanes (>=512-lane tiles already sit near the HBM roofline knee).
    itemsize = max(np.dtype(pred.dtype).itemsize, np.dtype(targ.dtype).itemsize)
    per_lane = 2 * 2 * C * itemsize
    ts = max(128, min(2048, ((8 << 20) // per_lane) // 128 * 128))
    ts = min(ts, pl.cdiv(S, 128) * 128)      # don't over-tile tiny inputs
    s_pad = pl.cdiv(S, ts) * ts
    apply_mask = s_pad != S
    if apply_mask:
        pad = ((0, 0), (0, 0), (0, s_pad - S))
        pred = jnp.pad(pred, pad)   # padded softmax is masked in-kernel
        targ = jnp.pad(targ, pad)   # zero padding contributes nothing

    kernel = functools.partial(
        _dice_kernel, smooth=float(smooth), p_pow=p_pow, ts=ts,
        s_valid=S, apply_mask=apply_mask)

    out = pl.pallas_call(
        kernel,
        out_shape=jax.ShapeDtypeStruct((N, 1, 128), jnp.float32),
        grid_spec=pltpu.PrefetchScalarGridSpec(
            num_scalar_prefetch=0,
            grid=(N, s_pad // ts),
            in_specs=[
                pl.BlockSpec((1, C, ts), lambda n, s: (n, 0, s)),
                pl.BlockSpec((1, C, ts), lambda n, s: (n, 0, s)),
            ],
            out_specs=pl.BlockSpec((1, 1, 128), lambda n, s: (n, 0, 0)),
            scratch_shapes=[
                pltpu.VMEM((C, 1), jnp.float32),   # per-class num partials
                pltpu.VMEM((C, 1), jnp.float32),   # per-class den partials
            ],
        ),
        compiler_params=pltpu.CompilerParams(
            # batch axis megacore-parallel (v7x: 2 TCs); spatial reduction axis
            # stays sequential (scratch/output resident across it).
            dimension_semantics=("parallel", "arbitrary"),
            # above the 16/32 MiB scoped defaults, below v7x's 64 MiB physical
            vmem_limit_bytes=48 * 1024 * 1024,
        ),
    )(pred, targ)

    # per-batch partials -> mean over batch, then /C  (== sum / (N*C))
    return jnp.sum(out[:, 0, 0]) * (1.0 / (N * C))


def _dice_loss_ref(predict, target, smooth=1.0, p_pow=2):
    """Pure-JAX reference mirroring the PyTorch module."""
    N, C = predict.shape[0], predict.shape[1]
    pred = jax.nn.softmax(predict, axis=1)
    pred = pred.reshape(N, C, -1)
    targ = target.reshape(N, C, -1)
    total = jnp.float32(0.0)
    for i in range(C):
        p_i, t_i = pred[:, i], targ[:, i]
        num = jnp.sum(p_i * t_i, axis=1) + smooth
        den = jnp.sum(p_i ** p_pow + t_i ** p_pow, axis=1) + smooth
        total = total + jnp.mean(1.0 - num / den)
    return total / C


if __name__ == "__main__":
    key = jax.random.PRNGKey(0)
    k1, k2 = jax.random.split(key)
    N, C, H, W = 2, 4, 16, 16
    predict = jax.random.normal(k1, (N, C, H, W), dtype=jnp.float32)
    # target: one-hot encoded class map (same shape as predict)
    labels = jax.random.randint(k2, (N, H, W), 0, C)
    target = jax.nn.one_hot(labels, C, axis=1, dtype=jnp.float32)

    loss = jax.block_until_ready(dice_loss(predict, target))
    ref = jax.block_until_ready(_dice_loss_ref(predict, target))
    assert np.allclose(np.asarray(loss), np.asarray(ref), rtol=1e-5, atol=1e-6), (
        loss, ref)
    print("KERNEL_OK")
</pallas_src>

<mosaic_0001>
module attributes {stable_mosaic.version = 11 : i64} {
  func.func @_dice_kernel(%arg0: i32, %arg1: i32, %arg2: memref<1x4x256xf32, #tpu.memory_space<vmem>>, %arg3: memref<1x4x256xf32, #tpu.memory_space<vmem>>, %arg4: memref<1x1x128xf32, #tpu.memory_space<vmem>>, %arg5: memref<4x1xf32, #tpu.memory_space<vmem>>, %arg6: memref<4x1xf32, #tpu.memory_space<vmem>>) attributes {dimension_semantics = [#tpu.dimension_semantics<parallel>, #tpu.dimension_semantics<arbitrary>], iteration_bounds = array<i64: 2, 1>, scalar_prefetch = 0 : i64, scratch_operands = 2 : i64, tpu.core_type = #tpu.core_type<tc>, window_params = [{transform_indices = @transform_0, window_bounds = array<i64: 1, 4, 256>}, {transform_indices = @transform_1, window_bounds = array<i64: 1, 4, 256>}, {transform_indices = @transform_2, window_bounds = array<i64: 1, 1, 128>}]} {
    %c0_i32 = arith.constant 0 : i32
    %0 = arith.cmpi eq, %arg1, %c0_i32 : i32
    %1 = arith.extui %0 : i1 to i32
    %c0_i32_0 = arith.constant 0 : i32
    %2 = arith.cmpi ne, %1, %c0_i32_0 : i32
    scf.if %2 {
      %cst_20 = arith.constant 0.000000e+00 : f32
      %36 = vector.broadcast %cst_20 : f32 to vector<4x1xf32>
      %c0_21 = arith.constant 0 : index
      %c0_22 = arith.constant 0 : index
      %37 = vector.load %arg5[%c0_21, %c0_22] : memref<4x1xf32, #tpu.memory_space<vmem>>, vector<4x1xf32>
      tpu.vector_store %arg5[%c0_21, %c0_22], %36 {strides = array<i32>} : memref<4x1xf32, #tpu.memory_space<vmem>>, vector<4x1xf32>,
      %cst_23 = arith.constant 0.000000e+00 : f32
      %38 = vector.broadcast %cst_23 : f32 to vector<4x1xf32>
      %c0_24 = arith.constant 0 : index
      %c0_25 = arith.constant 0 : index
      %39 = vector.load %arg6[%c0_24, %c0_25] : memref<4x1xf32, #tpu.memory_space<vmem>>, vector<4x1xf32>
      tpu.vector_store %arg6[%c0_24, %c0_25], %38 {strides = array<i32>} : memref<4x1xf32, #tpu.memory_space<vmem>>, vector<4x1xf32>,
    } else {
    }
    %c0 = arith.constant 0 : index
    %c0_1 = arith.constant 0 : index
    %c0_2 = arith.constant 0 : index
    %3 = vector.load %arg2[%c0, %c0_1, %c0_2] : memref<1x4x256xf32, #tpu.memory_space<vmem>>, vector<1x4x256xf32>
    %4 = vector.shape_cast %3 : vector<1x4x256xf32> to vector<4x256xf32>
    %c0_3 = arith.constant 0 : index
    %c0_4 = arith.constant 0 : index
    %c0_5 = arith.constant 0 : index
    %5 = vector.load %arg3[%c0_3, %c0_4, %c0_5] : memref<1x4x256xf32, #tpu.memory_space<vmem>>, vector<1x4x256xf32>
    %6 = vector.shape_cast %5 : vector<1x4x256xf32> to vector<4x256xf32>
    %cst = arith.constant dense<0xFF800000> : vector<256xf32>
    %7 = vector.multi_reduction <maximumf>, %4, %cst [0] : vector<4x256xf32> to vector<256xf32>
    %8 = vector.shape_cast %7 : vector<256xf32> to vector<1x256xf32>
    %9 = vector.broadcast %8 : vector<1x256xf32> to vector<4x256xf32>
    %10 = arith.subf %4, %9 : vector<4x256xf32>
    %11 = math.exp %10 : vector<4x256xf32>
    %cst_6 = arith.constant dense<0.000000e+00> : vector<256xf32>
    %12 = vector.multi_reduction <add>, %11, %cst_6 [0] : vector<4x256xf32> to vector<256xf32>
    %13 = vector.shape_cast %12 : vector<256xf32> to vector<1x256xf32>
    %14 = tpu.reciprocal %13 : vector<1x256xf32> -> vector<1x256xf32>
    %15 = vector.broadcast %14 : vector<1x256xf32> to vector<4x256xf32>
    %16 = arith.mulf %11, %15 : vector<4x256xf32>
    %17 = arith.mulf %16, %16 : vector<4x256xf32>
    %18 = arith.mulf %6, %6 : vector<4x256xf32>
    %c0_7 = arith.constant 0 : index
    %c0_8 = arith.constant 0 : index
    %19 = vector.load %arg5[%c0_7, %c0_8] : memref<4x1xf32, #tpu.memory_space<vmem>>, vector<4x1xf32>
    %20 = arith.mulf %16, %6 : vector<4x256xf32>
    %cst_9 = arith.constant dense<0.000000e+00> : vector<4xf32>
    %21 = vector.multi_reduction <add>, %20, %cst_9 [1] : vector<4x256xf32> to vector<4xf32>
    %22 = vector.shape_cast %21 : vector<4xf32> to vector<4x1xf32>
    %23 = arith.addf %19, %22 : vector<4x1xf32>
    %c0_10 = arith.constant 0 : index
    %c0_11 = arith.constant 0 : index
    %24 = vector.load %arg5[%c0_10, %c0_11] : memref<4x1xf32, #tpu.memory_space<vmem>>, vector<4x1xf32>
    tpu.vector_store %arg5[%c0_10, %c0_11], %23 {strides = array<i32>} : memref<4x1xf32, #tpu.memory_space<vmem>>, vector<4x1xf32>,
    %c0_12 = arith.constant 0 : index
    %c0_13 = arith.constant 0 : index
    %25 = vector.load %arg6[%c0_12, %c0_13] : memref<4x1xf32, #tpu.memory_space<vmem>>, vector<4x1xf32>
    %cst_14 = arith.constant dense<0.000000e+00> : vector<4xf32>
    %26 = vector.multi_reduction <add>, %17, %cst_14 [1] : vector<4x256xf32> to vector<4xf32>
    %27 = vector.shape_cast %26 : vector<4xf32> to vector<4x1xf32>
    %cst_15 = arith.constant dense<0.000000e+00> : vector<4xf32>
    %28 = vector.multi_reduction <add>, %18, %cst_15 [1] : vector<4x256xf32> to vector<4xf32>
    %29 = vector.shape_cast %28 : vector<4xf32> to vector<4x1xf32>
    %30 = arith.addf %27, %29 : vector<4x1xf32>
    %31 = arith.addf %25, %30 : vector<4x1xf32>
    %c0_16 = arith.constant 0 : index
    %c0_17 = arith.constant 0 : index
    %32 = vector.load %arg6[%c0_16, %c0_17] : memref<4x1xf32, #tpu.memory_space<vmem>>, vector<4x1xf32>
    tpu.vector_store %arg6[%c0_16, %c0_17], %31 {strides = array<i32>} : memref<4x1xf32, #tpu.memory_space<vmem>>, vector<4x1xf32>,
    %c0_i32_18 = arith.constant 0 : i32
    %33 = arith.cmpi eq, %arg1, %c0_i32_18 : i32
    %34 = arith.extui %33 : i1 to i32
    %c0_i32_19 = arith.constant 0 : i32
    %35 = arith.cmpi ne, %34, %c0_i32_19 : i32
    scf.if %35 {
      %c0_20 = arith.constant 0 : index
      %c0_21 = arith.constant 0 : index
      %36 = vector.load %arg5[%c0_20, %c0_21] : memref<4x1xf32, #tpu.memory_space<vmem>>, vector<4x1xf32>
      %cst_22 = arith.constant 1.000000e+00 : f32
      %37 = vector.broadcast %cst_22 : f32 to vector<4x1xf32>
      %38 = arith.addf %36, %37 : vector<4x1xf32>
      %c0_23 = arith.constant 0 : index
      %c0_24 = arith.constant 0 : index
      %39 = vector.load %arg6[%c0_23, %c0_24] : memref<4x1xf32, #tpu.memory_space<vmem>>, vector<4x1xf32>
      %cst_25 = arith.constant 1.000000e+00 : f32
      %40 = vector.broadcast %cst_25 : f32 to vector<4x1xf32>
      %41 = arith.addf %39, %40 : vector<4x1xf32>
      %42 = arith.divf %38, %41 : vector<4x1xf32>
      %cst_26 = arith.constant 1.000000e+00 : f32
      %43 = vector.broadcast %cst_26 : f32 to vector<4x1xf32>
      %44 = arith.subf %43, %42 : vector<4x1xf32>
      %45 = vector.shape_cast %44 : vector<4x1xf32> to vector<1x4x1xf32>
      %cst_27 = arith.constant dense<0.000000e+00> : vector<1xf32>
      %46 = vector.multi_reduction <add>, %45, %cst_27 [1, 2] : vector<1x4x1xf32> to vector<1xf32>
      %47 = vector.shape_cast %46 : vector<1xf32> to vector<1x1x1xf32>
      %48 = vector.extract %47[0, 0, 0] : f32 from vector<1x1x1xf32>
      %cst_28 = arith.constant 0.000000e+00 : f32
      %49 = vector.broadcast %cst_28 : f32 to vector<1x1x128xf32>
      %50 = vector.broadcast %48 : f32 to vector<1x1x128xf32>
      %51 = arith.addf %49, %50 : vector<1x1x128xf32>
      %c0_29 = arith.constant 0 : index
      %c0_30 = arith.constant 0 : index
      %c0_31 = arith.constant 0 : index
      %52 = vector.load %arg4[%c0_29, %c0_30, %c0_31] : memref<1x1x128xf32, #tpu.memory_space<vmem>>, vector<1x1x128xf32>
      tpu.vector_store %arg4[%c0_29, %c0_30, %c0_31], %51 {strides = array<i32>} : memref<1x1x128xf32, #tpu.memory_space<vmem>>, vector<1x1x128xf32>,
    } else {
    }
    return
  }
  func.func @transform_0(%arg0: i32, %arg1: i32) -> (i32, i32, i32) {
    %c0_i32 = arith.constant 0 : i32
    %c0_i32_0 = arith.constant 0 : i32
    return %arg0, %c0_i32, %arg1 : i32, i32, i32
  }
  func.func @transform_1(%arg0: i32, %arg1: i32) -> (i32, i32, i32) {
    %c0_i32 = arith.constant 0 : i32
    %c0_i32_0 = arith.constant 0 : i32
    return %arg0, %c0_i32, %arg1 : i32, i32, i32
  }
  func.func @transform_2(%arg0: i32, %arg1: i32) -> (i32, i32, i32) {
    %c0_i32 = arith.constant 0 : i32
    %c0_i32_0 = arith.constant 0 : i32
    %c0_i32_1 = arith.constant 0 : i32
    return %arg0, %c0_i32, %c0_i32_0 : i32, i32, i32
  }
}

</mosaic_0001>

<bundles_post_ra>
// kernel: tpu_custom_call.1
= control target key start
LH: loop header
LB: loop body
LE: loop exit
PB: predicated region body
PF: predicated region fallthrough
CT: control target
= control target key end

     0   :  { %7 = vsyncpa [#allocation5], 0  ;;  %s895_s0 = inlined_call_operand.hbm [shape: f32[2,4,256], index: 0, kind: input, shape index: {}]   ;;  %s896_s1 = inlined_call_operand.hbm [shape: f32[2,4,256], index: 1, kind: input, shape index: {}]   ;;  %s897_s2 = inlined_call_operand.hbm [shape: f32[2,1,128], index: 2, kind: output, shape index: {}]  }
   0x1   :  { %9 = vsyncpa [#allocation5 + $0x1], 0 }
   0x2   :  { %10 = vsyncpa [#allocation8], 0 }
   0x3   :  { %12 = vsyncpa [#allocation8 + $0x1], 0 }
   0x4   :  { %13 = vsyncpa [#allocation6], 0 }
   0x5   :  { %15 = vsyncpa [#allocation6 + $0x1], 0  ;;  %s709_s9 = smov 0   ;;  %s711_s10 = smov 0  }
   0x6   :  { %s713_s11 = smov 0   ;;  %s715_s12 = smov 0  }
   0x7   :  { %s717_s13 = smov 0   ;;  %s719_s14 = smov 0  }
   0x8 LB: > { %s451_s15 = sadd.s32 4294967295, %s688_s14   ;;  %s452_s16 = sadd.s32 4294967294, %s688_s14   ;;  %s688_s14 = sphi %s719_s14, %s21_s14   ;;  %s684_s13 = sphi %s717_s13, %s909_s13   ;;  %s680_s12 = sphi %s715_s12, %s908_s12   ;;  %s676_s11 = sphi %s713_s11, %s907_s11   ;;  %s672_s10 = sphi %s711_s10, %s906_s10   ;;  %s668_s9 = sphi %s709_s9, %s905_s9  }
   0x9   : > { %s33_s17 = sadd.s32 1, %s684_s13  ;;  %s42_s18 = sadd.s32 1, %s676_s11 }
   0xa   : > { %p35_p0 = scmp.ge.s32.totalorder %s33_s17, 2  ;;  %p49_p1 = scmp.ne.s32.totalorder %s676_s11, %s672_s10 }
   0xb   : > { %p50_p2 = scmp.eq.s32.totalorder %s688_s14, 0  ;;  %p55_p3 = scmp.ne.s32.totalorder %s672_s10, %s668_s9 }
   0xc   : > { %s911_s17 = smov (%p35_p0, %s33_s17), 0  ;;  %p56_p5 = scmp.eq.s32.totalorder %s451_s15, 0 }
   0xd   : > { %p750_p4 = por %p50_p2, %p49_p1  ;;  %s37_s20 = ssub.s32 %s684_s13, %s911_s17 }
   0xe   : > { %p107_p6 = scmp.eq.s32.totalorder %s451_s15, 1  ;;  %p40_p7 = scmp.eq.s32.totalorder %s37_s20, 0 }
   0xf   : > { %p756_p8 = por %p56_p5, %p55_p3  ;;  %p113_p10 = scmp.eq.s32.totalorder %s452_s16, 1 }
  0x10   : > { %p760_p9 = por %p107_p6, %p49_p1  ;;  %p488_p13 = scmp.lt.s32.totalorder %s688_s14, 2 }
  0x11   : > { %s765_s23 = scalar_select %p40_p7, %s676_s11, %s42_s18  }
  0x12   : > { %p767_p11 = por %p113_p10, %p55_p3  ;;  %s774_s25 = sand.u32 1, %s676_s11  }
  0x13   : > { %s455_s26 = sshll.u32 %s774_s25, 3  ;;  %s467_s27 = sshll.u32 %s684_s13, 7 }
  0x14   : > { %s145_s30 = scalar_lea.hbm %s895_s0, %s467_s27  ;;  %s137_s3 = scalar_lea.vmem [#allocation4], %s455_s26 }
  0x15   : > { %s147_s4 = sshll.u32 %s137_s3, 4  ;;  %p783_p0 = pnand %p488_p13, %p750_p4  ;;  %s148_s4 = int_to_ptr.vmem [resolvable:$true] %s147_s4 }
  0x16   : > { %p461_p1 = scmp.ge.s32.totalorder %s688_s14, 1  ;;  %p173_p2 = scmp.lt.s32.totalorder %s688_s14, 3 }
  0x17   : > { %s134_s6 = scalar_lea.sflag [#allocation5], %s774_s25  ;;  %p550_p3 = pneg %p783_p0 }
  0x18   : > { %s561_s7 = scalar_lea.vmem %s148_s4, 128  ;;  %s690_s8 = smov [#allocation4]  }
  0x19   : > { %p562_p5 = scmp.ne.s32.totalorder %s148_s4, %s561_s7  ;;  %s566_s15 = sshll.u32 %s690_s8, 4  ;;  %s567_s15 = int_to_ptr.vmem [resolvable:$false] %s566_s15 }
  0x1a   : > { %s568_s16 = scalar_lea.vmem %s567_s15, 256  ;;  %p569_p4 = scmp.lt.s32.totalorder %s148_s4, %s567_s15 }
  0x1b   : > { %p564_p6 = pnand %p562_p5, %p550_p3  ;;  %p570_p10 = scmp.lt.s32.totalorder %s568_s16, %s561_s7 }
  0x1d   : > { %p565_p7 = pneg %p564_p6  ;;  %p571_p13 = por %p570_p10, %p569_p4 }
  0x1f   : > { %p572_p12 = pnand %p571_p13, %p565_p7 }
  0x21   : > { %575 = shalt.err (!%p572_p12)
}
  0x22   : > { %480 = dma.hbm_to_vmem [thread:$0]  (!%p783_p0), %s145_s30, 128, %s148_s4, %s134_s6  }
  0x23   : > { %p801_p5 = pnand %p461_p1, %p173_p2  ;;  %s166_s28 = scalar_lea.hbm %s896_s1, %s467_s27 }
  0x24   : > { %s158_s29 = scalar_lea.vmem [#allocation7], %s455_s26  ;;  %s155_s7 = scalar_lea.sflag [#allocation8], %s774_s25 }
  0x25   : > { %s168_s3 = sshll.u32 %s158_s29, 4  ;;  %s691_s30 = smov [#allocation7]   ;;  %s169_s3 = int_to_ptr.vmem [resolvable:$true] %s168_s3 }
  0x26   : > { %s589_s8 = scalar_lea.vmem %s169_s3, 128  ;;  %s594_s4 = sshll.u32 %s691_s30, 4  ;;  %s595_s4 = int_to_ptr.vmem [resolvable:$false] %s594_s4 }
  0x27   : > { %p590_p12 = scmp.ne.s32.totalorder %s169_s3, %s589_s8  ;;  %s596_s6 = scalar_lea.vmem %s595_s4, 256 }
  0x28   : > { %p597_p1 = scmp.lt.s32.totalorder %s169_s3, %s595_s4  ;;  %p598_p2 = scmp.lt.s32.totalorder %s596_s6, %s589_s8 }
  0x29   : > { %p592_p6 = pnand %p590_p12, %p550_p3 }
  0x2a   : > { %p599_p4 = por %p598_p2, %p597_p1 }
  0x2b   : > { %p593_p7 = pneg %p592_p6 }
  0x2d   : > { %p600_p10 = pnand %p599_p4, %p593_p7 }
  0x2f   : > { %603 = shalt.err (!%p600_p10)
}
  0x30   : > { %483 = dma.hbm_to_vmem [thread:$0]  (!%p783_p0), %s166_s28, 128, %s169_s3, %s155_s7  }
  0x31   : > { %177 = sbr.rel (%p801_p5) target bundleno = 522 (0x20a), region = 28  ;;  %s817_s25 = sand.u32 (!%p801_p5), 1, %s672_s10  }
  0x32   : > { %s462_s26 = sshll.u32 (!%p801_p5), %s817_s25, 3  ;;  %s180_s27 = scalar_lea.sflag (!%p801_p5), [#allocation5], %s817_s25 }
  0x33   : > { %s183_s15 = scalar_lea.vmem (!%p801_p5), [#allocation4], %s462_s26 }
  0x36   : > { %655 = dma.done.wait (%p756_p8), %s180_s27, 128  }
  0x37   : > { %657 = vsyncadd (%p756_p8), %s180_s27, 4294967168  ;;  %s189_s5 = scalar_lea.sflag [#allocation8], %s817_s25  ;;  %s826_s16 = scalar_lea.vmem [#allocation7], %s462_s26 }
  0x38   : > { %659 = dma.done.wait (%p756_p8), %s189_s5, 128  }
  0x39   : > { %661 = vsyncadd (%p756_p8), %s189_s5, 4294967168  ;;  %vm231_vm0 = vcmask 1043456   ;;  %v226_v0 = vld [vmem:[%s183_s15] sm:$0xff]  ;;  %v227_v36 = vld [vmem:[%s826_s16] sm:$0xff]  ;;  %vm223_vm1 = vcmask 3072   ;;  %v692_v55 = vmov 0.0  }
  0x3a   : > { %v229_v1 = vcombine.high %v226_v0, %v226_v0  ;;  %v232_v2 = vsel %vm231_vm0, %v226_v0, -inf  ;;  %v278_v39 = vmul.f32 %v227_v36, %v227_v36  ;;  %225 = vst.msk [vmem:[#allocation3] sm:$0xf] %vm223_vm1, %v692_v55  ;;  %224 = vst.msk [vmem:[#allocation2] sm:$0xf] %vm223_vm1, %v692_v55  ;;  %s216_s21 = scalar_lea.vmem [#allocation9], %s817_s25 }
  0x3b   : > { %v233_v3 = vrot.slane %v232_v2, 4  ;;  %s348_s18 = sshll.u32 %s216_s21, 4  ;;  %s464_s19 = sshll.u32 %s680_s12, 4  ;;  %s850_s18 = int_to_ptr.vmem [resolvable:$true] %s348_s18 }
  0x3c   : > { %v239_v4 = vsel %vm231_vm0, %v229_v1, -inf  ;;  %v302_v42 = vcombine.high %v278_v39, %v278_v39  ;;  %v304_v49 = vsel %vm231_vm0, %v278_v39, 0.0  ;;  %s346_s3 = scalar_lea.hbm %s897_s2, %s464_s19  ;;  %s336_s7 = scalar_lea.sflag [#allocation6], %s817_s25 }
  0x3d   : > { %v234_v5 = vmax.f32 %v232_v2, %v233_v3  ;;  %v240_v6 = vrot.slane %v239_v4, 4  ;;  %s604_s8 = scalar_lea.vmem %s850_s18, 16  ;;  %s693_s30 = smov [#allocation9]  }
  0x3e   : > { %v305_v50 = vsel %vm231_vm0, %v302_v42, 0.0  ;;  %p605_p8 = scmp.ne.s32.totalorder %s850_s18, %s604_s8  ;;  %s608_s12 = sshll.u32 %s693_s30, 4  ;;  %s609_s12 = int_to_ptr.vmem [resolvable:$false] %s608_s12 }
  0x3f   : > { %v235_v7 = vrot.slane %v234_v5, 2  ;;  %v241_v8 = vmax.f32 %v239_v4, %v240_v6  ;;  %v306_v54 = vadd.f32 %v305_v50, %v304_v49  ;;  %s610_s4 = scalar_lea.vmem %s609_s12, 32  ;;  %p611_p13 = scmp.lt.s32.totalorder %s850_s18, %s609_s12 }
  0x40   : > { %p606_p0 = pnand %p605_p8, %p760_p9  ;;  %p612_p5 = scmp.lt.s32.totalorder %s610_s4, %s604_s8 }
  0x41   : > { %v236_v9 = vmax.f32 %v234_v5, %v235_v7  ;;  %v242_v10 = vrot.slane %v241_v8, 2  ;;  %v279_v56 = vld [vmem:[#allocation2] sm:$0xf]  ;;  %v292_v61 = vld [vmem:[#allocation3] sm:$0xf] }
  0x42   : > { %p607_p3 = pneg %p606_p0  ;;  %p613_p12 = por %p612_p5, %p611_p13 }
  0x43   : > { %v237_v11 = vrot.slane %v236_v9, 1  ;;  %v243_v12 = vmax.f32 %v241_v8, %v242_v10 }
  0x44   : > { %p614_p6 = pnand %p613_p12, %p607_p3 }
  0x45   : > { %v238_v13 = vmax.f32 %v236_v9, %v237_v11  ;;  %v244_v14 = vrot.slane %v243_v12, 1 }
  0x47   : > { %v245_v15 = vmax.f32 %v243_v12, %v244_v14 }
  0x49   : > { %v248_v16 = vcombine.low %v238_v13, %v245_v15 }
  0x4b   : > { %v250_v17 = vsub.f32 %v226_v0, %v248_v16 }
  0x4d   : > { %v251_v18 = vmul.f32 1.442695, %v250_v17 }
  0x4f   : > { %540 = vpow2.f32 %v251_v18 }
  0x5c   : > { %v541_v19 = vpop.eup %540 }
  0x5d   : > { %v254_v20 = vcombine.high %v541_v19, %v541_v19  ;;  %v256_v21 = vsel %vm231_vm0, %v541_v19, 0.0 }
  0x5e   : > { %v257_v22 = vrot.slane %v256_v21, 4 }
  0x5f   : > { %v263_v23 = vsel %vm231_vm0, %v254_v20, 0.0 }
  0x60   : > { %v258_v24 = vadd.f32 %v257_v22, %v256_v21  ;;  %v264_v25 = vrot.slane %v263_v23, 4 }
  0x62   : > { %v259_v26 = vrot.slane %v258_v24, 2  ;;  %v265_v27 = vadd.f32 %v264_v25, %v263_v23 }
  0x64   : > { %v260_v28 = vadd.f32 %v259_v26, %v258_v24  ;;  %v266_v29 = vrot.slane %v265_v27, 2 }
  0x66   : > { %v261_v30 = vrot.slane %v260_v28, 1  ;;  %v267_v31 = vadd.f32 %v266_v29, %v265_v27 }
  0x68   : > { %v262_v32 = vadd.f32 %v261_v30, %v260_v28  ;;  %v268_v33 = vrot.slane %v267_v31, 1 }
  0x6a   : > { %v269_v34 = vadd.f32 %v268_v33, %v267_v31  ;;  %542 = vrcp.f32 %v262_v32 }
  0x6c   : > { %544 = vrcp.f32 %v269_v34 }
  0x77   : > { %v543_v35 = vpop.eup %542 }
  0x79   : > { %v545_v37 = vpop.eup %544 }
  0x7a   : > { %v274_v38 = vcombine.low %v543_v35, %v545_v37 }
  0x7c   : > { %v276_v40 = vmul.f32 %v541_v19, %v274_v38 }
  0x7e   : > { %v277_v41 = vmul.f32 %v276_v40, %v276_v40  ;;  %v280_v43 = vmul.f32 %v276_v40, %v227_v36 }
  0x80   : > { %v294_v44 = vcombine.high %v277_v41, %v277_v41  ;;  %v296_v45 = vsel %vm231_vm0, %v277_v41, 0.0  ;;  %v282_v46 = vcombine.high %v280_v43, %v280_v43  ;;  %v284_v47 = vsel %vm231_vm0, %v280_v43, 0.0 }
  0x82   : > { %v297_v48 = vsel %vm231_vm0, %v294_v44, 0.0  ;;  %v285_v51 = vsel %vm231_vm0, %v282_v46, 0.0 }
  0x83   : > { %v298_v52 = vadd.f32 %v297_v48, %v296_v45  ;;  %v286_v53 = vadd.f32 %v285_v51, %v284_v47 }
  0x85   : > { %299 = vadd.xlane.f32.xlu0 %v298_v52  ;;  %287 = vadd.xlane.f32.xlu1 %v286_v53 }
  0x89   : > { %307 = vadd.xlane.f32.xlu0 %v306_v54 }
 0x10e   : > { %v300_v57 = vpop.xlane.xlu0 %299  ;;  %v288_v58 = vpop.xlane.xlu1 %287 }
 0x10f   : > { %v289_v59 = vadd.f32 %v288_v58, %v279_v56 }
 0x111   : > { %291 = vst.msk [vmem:[#allocation2] sm:$0xf] %vm223_vm1, %v289_v59 }
 0x112   : > { %v308_v60 = vpop.xlane.xlu0 %307 }
 0x113   : > { %v309_v62 = vadd.f32 %v308_v60, %v300_v57 }
 0x115   : > { %v310_v63 = vadd.f32 %v309_v62, %v292_v61 }
 0x117   : > { %311 = vst.msk [vmem:[#allocation3] sm:$0xf] %vm223_vm1, %v310_v63 }
 0x118   : > { %v315_v2 = vld [vmem:[#allocation2] sm:$0xf] }
 0x119   : > { %v316_v3 = vadd.f32 1.0, %v315_v2 }
 0x11e   : > { %v317_v0 = vld [vmem:[#allocation3] sm:$0xf] }
 0x11f   : > { %v318_v1 = vadd.f32 1.0, %v317_v0 }
 0x121   : > { %546 = vrcp.f32 %v318_v1 }
 0x12e   : > { %v547_v4 = vpop.eup %546 }
 0x12f   : > { %v320_v5 = vmul.f32 %v547_v4, %v316_v3 }
 0x131   : > { %v321_v6 = vsub.f32 1.0, %v320_v5 }
 0x133   : > { %v322_v7 = vsel %vm223_vm1, %v321_v6, 0.0 }
 0x134   : > { %323 = vadd.xlane.f32.xlu1 %v322_v7 }
 0x1bd   : > { %v324_v8 = vpop.xlane.xlu1 %323 }
 0x1be   : > { %v325_v9 = vrot.slane %v324_v8, 4 }
 0x1c0   : > { %v326_v10 = vadd.f32 %v325_v9, %v324_v8 }
 0x1c2   : > { %v327_v11 = vrot.slane %v326_v10, 2 }
 0x1c4   : > { %v328_v12 = vadd.f32 %v327_v11, %v326_v10 }
 0x1c6   : > { %v329_v13 = vrot.slane %v328_v12, 1 }
 0x1c8   : > { %v330_v14 = vadd.f32 %v329_v13, %v328_v12 }
 0x1ca   : > { %469 = vpush %v330_v14 }
 0x1fb   : > { %s470_s20 = spop %469 }
 0x1fc   : > { %v332_v15 = vstv %s470_s20 }
 0x1fd   : > { %334 = vst [vmem:[%s216_s21] sm:$0x1] %v332_v15 }
 0x1fe   : > { %617 = shalt.err (!%p614_p6)
}
 0x1ff   : > { %s618_s6 = scalar_lea.hbm %s346_s3, 16  ;;  %s622_s27 = scalar_lea.hbm %s897_s2, 32 }
 0x200   : > { %p619_p7 = scmp.ne.s32.totalorder %s346_s3, %s618_s6  ;;  %p623_p4 = scmp.lt.s32.totalorder %s346_s3, %s897_s2 }
 0x201   : > { %p624_p10 = scmp.lt.s32.totalorder %s622_s27, %s618_s6 }
 0x202   : > { %p620_p1 = pnand %p619_p7, %p760_p9 }
 0x203   : > { %p625_p8 = por %p624_p10, %p623_p4 }
 0x204   : > { %p621_p2 = pneg %p620_p1 }
 0x206   : > { %p626_p0 = pnand %p625_p8, %p621_p2 }
 0x208   : > { %629 = shalt.err (!%p626_p0)
}
 0x209   : > { %475 = dma.vmem_to_hbm [thread:$0]  (%p760_p9), %s850_s18, 16, %s346_s3, %s336_s7  }
 0x20a PF: > { %s360_s16 = sand.u32 1, %s668_s9   ;;  %p904_p3 = scmp.ge.s32.totalorder %s688_s14, 2 }
 0x20b   : > { %s361_s21 = scalar_lea.sflag [#allocation6], %s360_s16 }
 0x20c   : > { %p485_p13 = pnand %p904_p3, %p767_p11 }
 0x20e   : > { %p486_p5 = pneg %p485_p13 }
 0x210   : > { %663 = dma.done.wait (%p486_p5), %s361_s21, 16  }
 0x211   : > { %665 = vsyncadd (%p486_p5), %s361_s21, 4294967280  ;;  %s21_s14 = sadd.s32 1, %s688_s14   ;;  %s905_s9 = smov %s672_s10 }
 0x212   : > { %p18_p12 = scmp.ge.s32.totalorder %s21_s14, 4   ;;  %s906_s10 = smov %s676_s11 }
 0x213   : > { %s907_s11 = smov %s765_s23  ;;  %s908_s12 = smov %s684_s13 }
 0x214   : > { %s909_s13 = smov %s911_s17  ;;  %20 = sbr.rel (!%p18_p12) target bundleno = 8 (0x8), region = 94 }
 0x219   :  { %365 = vsyncpa [#allocation5], 1 }
 0x21a   :  { %367 = vsyncpa [#allocation5 + $0x1], 1 }
 0x21b   :  { %368 = vsyncpa [#allocation8], 1 }
 0x21c   :  { %370 = vsyncpa [#allocation8 + $0x1], 1 }
 0x21d   :  { %371 = vsyncpa [#allocation6], 1 }
 0x21e   :  { %373 = vsyncpa [#allocation6 + $0x1], 1 }

</bundles_post_ra>
